<compile_context>
chip_gen: v5e
topology: v5e:2x2
jax: 0.10.0
libtpu: 0.0.40
codegen_flags: <defaults>
</compile_context>

<pallas_src>
import jax
import jax.numpy as jnp
from jax.experimental import pallas as pl
from jax.experimental.pallas import tpu as pltpu


def _round_up(v, m):
    return (v + m - 1) // m * m


def _predictor_kernel(x_ref, w_ref, b_ref, out_ref):
    # x_ref:   (TILE_N, C_pad)  bf16   -- one tile of RoI features
    # w_ref:   (C_pad, O_pad)   bf16   -- fused [cls | bbox] weights, resident
    # b_ref:   (1, O_pad)       f32    -- fused bias, resident
    # out_ref: (TILE_N, O_pad)  f32    -- fused [scores | bbox_deltas] tile
    acc = jnp.dot(x_ref[...], w_ref[...], preferred_element_type=jnp.float32)
    out_ref[...] = (acc + b_ref[...]).astype(out_ref.dtype)


def fast_rcnn_predictor(x, w_cls, b_cls, w_bbox, b_bbox, *, tile_n=256):
    """x: (N, C) or (N, C, 1, 1). Weights in (C, out) layout (PyTorch W.T)."""
    if x.ndim == 4:
        assert x.shape[2] == 1 and x.shape[3] == 1, "spatial dims must be [1, 1]"
    x2d = x.reshape(x.shape[0], -1)  # flatten(start_dim=1)

    n, c = x2d.shape
    num_classes = w_cls.shape[1]
    num_bbox = w_bbox.shape[1]
    out_total = num_classes + num_bbox

    # ---- Fuse the two linear heads along the output dimension. ----
    w = jnp.concatenate([w_cls, w_bbox], axis=1)                 # (C, out_total)
    b = jnp.concatenate([b_cls.reshape(-1), b_bbox.reshape(-1)])  # (out_total,)

    # ---- Pad contraction dim C and fused output dim to multiples of 128. ----
    c_pad = _round_up(c, 128)
    o_pad = _round_up(out_total, 128)
    if c_pad != c:
        x2d = jnp.pad(x2d, ((0, 0), (0, c_pad - c)))
        w = jnp.pad(w, ((0, c_pad - c), (0, 0)))
    if o_pad != out_total:
        w = jnp.pad(w, ((0, 0), (0, o_pad - out_total)))
        b = jnp.pad(b, (0, o_pad - out_total))

    # ---- Tile over N; pad N up to a tile multiple. ----
    tile_n = max(8, min(tile_n, _round_up(n, 8)))
    n_pad = _round_up(n, tile_n)
    if n_pad != n:
        x2d = jnp.pad(x2d, ((0, n_pad - n), (0, 0)))

    # ---- bf16 inputs, f32 accumulation / bias. ----
    x_bf = x2d.astype(jnp.bfloat16)
    w_bf = w.astype(jnp.bfloat16)
    b_f32 = b.reshape(1, -1).astype(jnp.float32)

    grid = (n_pad // tile_n,)
    cost = pl.CostEstimate(
        flops=2 * n_pad * c_pad * o_pad,
        transcendentals=0,
        bytes_accessed=(x_bf.size * 2 + w_bf.size * 2
                        + b_f32.size * 4 + n_pad * o_pad * 4),
    )

    fused = pl.pallas_call(
        _predictor_kernel,
        out_shape=jax.ShapeDtypeStruct((n_pad, o_pad), jnp.float32),
        grid_spec=pltpu.PrefetchScalarGridSpec(
            num_scalar_prefetch=0,
            grid=grid,
            in_specs=[
                # x tile marches over N; weights/bias stay resident (block (0,0)).
                pl.BlockSpec((tile_n, c_pad), lambda i: (i, 0)),
                pl.BlockSpec((c_pad, o_pad), lambda i: (0, 0)),
                pl.BlockSpec((1, o_pad), lambda i: (0, 0)),
            ],
            out_specs=pl.BlockSpec((tile_n, o_pad), lambda i: (i, 0)),
        ),
        compiler_params=pltpu.CompilerParams(
            dimension_semantics=("parallel",),
        ),
        cost_estimate=cost,
    )(x_bf, w_bf, b_f32)

    # ---- Strip padding and split the fused result back into the two heads. ----
    fused = fused[:n, :out_total]
    scores = fused[:, :num_classes]
    bbox_deltas = fused[:, num_classes:]
    return scores, bbox_deltas


def init_params(key, in_channels, num_classes):
    """Deterministic init mimicking nn.Linear default (uniform +/- 1/sqrt(fan_in))."""
    k1, k2, k3, k4 = jax.random.split(key, 4)
    bound = 1.0 / jnp.sqrt(jnp.float32(in_channels))
    # Stored transposed relative to PyTorch (C, out) so the kernel does x @ W.
    w_cls = jax.random.uniform(k1, (in_channels, num_classes), jnp.float32,
                               -bound, bound)
    b_cls = jax.random.uniform(k2, (num_classes,), jnp.float32, -bound, bound)
    w_bbox = jax.random.uniform(k3, (in_channels, num_classes * 4), jnp.float32,
                                -bound, bound)
    b_bbox = jax.random.uniform(k4, (num_classes * 4,), jnp.float32,
                                -bound, bound)
    return w_cls, b_cls, w_bbox, b_bbox


if __name__ == "__main__":
    key = jax.random.PRNGKey(0)
    kx, kp = jax.random.split(key)

    batch = 8          # number of RoIs
    in_channels = 32
    num_classes = 8

    # 4-D input (N, C, 1, 1), exercising the flatten path of forward().
    x = jax.random.normal(kx, (batch, in_channels, 1, 1), dtype=jnp.float32)
    w_cls, b_cls, w_bbox, b_bbox = init_params(kp, in_channels, num_classes)

    scores, bbox_deltas = fast_rcnn_predictor(x, w_cls, b_cls, w_bbox, b_bbox)
    jax.block_until_ready((scores, bbox_deltas))

    # Reference check in plain JAX (f32); bf16 inputs -> loosened tolerance.
    x2d = x.reshape(batch, -1)
    ref_scores = x2d @ w_cls + b_cls
    ref_bbox = x2d @ w_bbox + b_bbox
    assert scores.shape == (batch, num_classes)
    assert bbox_deltas.shape == (batch, num_classes * 4)
    assert jnp.allclose(scores, ref_scores, atol=3e-2, rtol=3e-2)
    assert jnp.allclose(bbox_deltas, ref_bbox, atol=3e-2, rtol=3e-2)

    print("KERNEL_OK")
</pallas_src>

<mosaic_0001>
module attributes {stable_mosaic.version = 11 : i64} {
  func.func @_predictor_kernel(%arg0: i32, %arg1: memref<8x128xbf16, #tpu.memory_space<vmem>>, %arg2: memref<128x128xbf16, #tpu.memory_space<vmem>>, %arg3: memref<1x128xf32, #tpu.memory_space<vmem>>, %arg4: memref<8x128xf32, #tpu.memory_space<vmem>>) attributes {dimension_semantics = [#tpu.dimension_semantics<parallel>], iteration_bounds = array<i64: 1>, scalar_prefetch = 0 : i64, scratch_operands = 0 : i64, tpu.core_type = #tpu.core_type<tc>, window_params = [{transform_indices = @transform_0, window_bounds = array<i64: 8, 128>}, {pipeline_mode = #tpu.pipeline_mode<synchronous>, transform_indices = @transform_1, window_bounds = array<i64: 128, 128>}, {pipeline_mode = #tpu.pipeline_mode<synchronous>, transform_indices = @transform_2, window_bounds = array<i64: 1, 128>}, {transform_indices = @transform_3, window_bounds = array<i64: 8, 128>}]} {
    %c0 = arith.constant 0 : index
    %c0_0 = arith.constant 0 : index
    %0 = vector.load %arg1[%c0, %c0_0] : memref<8x128xbf16, #tpu.memory_space<vmem>>, vector<8x128xbf16>
    %c0_1 = arith.constant 0 : index
    %c0_2 = arith.constant 0 : index
    %1 = vector.load %arg2[%c0_1, %c0_2] : memref<128x128xbf16, #tpu.memory_space<vmem>>, vector<128x128xbf16>
    %cst = arith.constant dense<0.000000e+00> : vector<8x128xf32>
    %2 = tpu.matmul %0, %1, %cst {dimension_numbers = #tpu.dot_dimension_numbers<[1], [0], [0], [1], [0, 0, 1, 1], [], []>} : vector<8x128xbf16>, vector<128x128xbf16>, vector<8x128xf32> -> vector<8x128xf32>
    %c0_3 = arith.constant 0 : index
    %c0_4 = arith.constant 0 : index
    %3 = vector.load %arg3[%c0_3, %c0_4] : memref<1x128xf32, #tpu.memory_space<vmem>>, vector<1x128xf32>
    %4 = vector.broadcast %3 : vector<1x128xf32> to vector<8x128xf32>
    %5 = arith.addf %2, %4 : vector<8x128xf32>
    %c0_5 = arith.constant 0 : index
    %c0_6 = arith.constant 0 : index
    %6 = vector.load %arg4[%c0_5, %c0_6] : memref<8x128xf32, #tpu.memory_space<vmem>>, vector<8x128xf32>
    tpu.vector_store %arg4[%c0_5, %c0_6], %5 {strides = array<i32>} : memref<8x128xf32, #tpu.memory_space<vmem>>, vector<8x128xf32>,
    return
  }
  func.func @transform_0(%arg0: i32) -> (i32, i32) {
    %c0_i32 = arith.constant 0 : i32
    %c0_i32_0 = arith.constant 0 : i32
    return %arg0, %c0_i32 : i32, i32
  }
  func.func @transform_1(%arg0: i32) -> (i32, i32) {
    %c0_i32 = arith.constant 0 : i32
    %c0_i32_0 = arith.constant 0 : i32
    %c0_i32_1 = arith.constant 0 : i32
    return %c0_i32, %c0_i32_0 : i32, i32
  }
  func.func @transform_2(%arg0: i32) -> (i32, i32) {
    %c0_i32 = arith.constant 0 : i32
    %c0_i32_0 = arith.constant 0 : i32
    %c0_i32_1 = arith.constant 0 : i32
    return %c0_i32, %c0_i32_0 : i32, i32
  }
  func.func @transform_3(%arg0: i32) -> (i32, i32) {
    %c0_i32 = arith.constant 0 : i32
    %c0_i32_0 = arith.constant 0 : i32
    return %arg0, %c0_i32 : i32, i32
  }
}

</mosaic_0001>

<bundles_post_ra>
// kernel: tpu_custom_call.1
= control target key start
LH: loop header
LB: loop body
LE: loop exit
PB: predicated region body
PF: predicated region fallthrough
CT: control target
= control target key end

     0   :  { %8 = vsyncpa [#allocation3], 0  ;;  %s307_s0 = inlined_call_operand.hbm [shape: bf16[8,128], index: 0, kind: input, shape index: {}]   ;;  %s308_s1 = inlined_call_operand.hbm [shape: bf16[128,128], index: 1, kind: input, shape index: {}]   ;;  %s309_s2 = inlined_call_operand.vmem [shape: f32[1,128], index: 2, kind: input, shape index: {}]   ;;  %s310_s3 = inlined_call_operand.hbm [shape: f32[8,128], index: 3, kind: output, shape index: {}]  }
   0x1   :  { %9 = vsyncpa [#allocation6], 0 }
   0x2   :  { %10 = vsyncpa [#allocation4], 0  ;;  %s16_s14 = sshll.u32 %s307_s0, 4  ;;  %s270_s15 = smov [#allocation2]   ;;  %s17_s14 = int_to_ptr.hbm [resolvable:$true] %s16_s14 }
   0x3   :  { %s18_s16 = sshll.u32 %s270_s15, 4  ;;  %s26_s19 = sshll.u32 %s308_s1, 4  ;;  %s19_s16 = int_to_ptr.vmem [resolvable:$true] %s18_s16  ;;  %s27_s19 = int_to_ptr.hbm [resolvable:$true] %s26_s19 }
   0x4   :  { %21 = dma.hbm_to_vmem [thread:$0]  %s17_s14, 64, %s19_s16, [#allocation3]  }
   0x5   :  { %s271_s20 = smov [#allocation5]   ;;  %s272_s22 = smov 64  }
   0x6   :  { %s28_s21 = sshll.u32 %s271_s20, 4  ;;  %s273_s23 = smov 4   ;;  %s29_s21 = int_to_ptr.vmem [resolvable:$true] %s28_s21 }
   0x7   :  { %34 = dma.hbm_to_vmem [thread:$0]  %s27_s19, 1024, %s29_s21, [#allocation6], %s272_s22, %s272_s22, %s273_s23  }
   0x8   :  { %264 = dma.done.wait [#allocation3], 64  }
   0x9   :  { %265 = vsyncadd [#allocation3], 4294967232 }
   0xa   :  { %266 = dma.done.wait [#allocation6], 1024  }
   0xb   :  { %267 = vsyncadd [#allocation6], 4294966272  ;;  %v185_v0 = vld [vmem:[#allocation5 + $0x38] sm:$0xff]  ;;  %v184_v1 = vld [vmem:[#allocation5 + $0x30] sm:$0xff]  ;;  %s274_s24 = smov [#allocation7]   ;;  %s135_s28 = sshll.u32 %s310_s3, 4  ;;  %s136_s28 = int_to_ptr.hbm [resolvable:$true] %s135_s28 }
   0xc   :  { %114 = vmatpush.bf16.msra.mxu0 %v185_v0  ;;  %v183_v2 = vld [vmem:[#allocation5 + $0x28] sm:$0xff]  ;;  %v182_v3 = vld [vmem:[#allocation5 + $0x20] sm:$0xff]  ;;  %v181_v4 = vld [vmem:[#allocation5 + $0x18] sm:$0xff]  ;;  %s133_s25 = sshll.u32 %s274_s24, 4  ;;  %s134_s25 = int_to_ptr.vmem [resolvable:$true] %s133_s25 }
   0xd   :  { %v180_v5 = vld [vmem:[#allocation5 + $0x10] sm:$0xff]  ;;  %v179_v6 = vld [vmem:[#allocation5 + $0x8] sm:$0xff]  ;;  %v178_v7 = vld [vmem:[#allocation5] sm:$0xff] }
   0xe   :  { %v45_v8 = vld [vmem:[#allocation2] sm:$0xf] }
   0xf   :  { %v191_v9 = vld [vmem:[%s309_s2] ss:$0 sm:$0xff] }
  0x10   :  { %115 = vmatpush.bf16.msra.mxu0 %v184_v1 }
  0x14   :  { %116 = vmatpush.bf16.msra.mxu0 %v183_v2 }
  0x18   :  { %117 = vmatpush.bf16.msra.mxu0 %v182_v3 }
  0x1c   :  { %118 = vmatpush.bf16.msra.mxu0 %v181_v4 }
  0x20   :  { %119 = vmatpush.bf16.msra.mxu0 %v180_v5 }
  0x24   :  { %120 = vmatpush.bf16.msra.mxu0 %v179_v6 }
  0x28   :  { %121 = vmatpush.bf16.msra.mxu0 %v178_v7 }
  0x2b   :  { %122 = vmatmul.bf16.vlgmr.msra.gmra.mxu0 %v45_v8 }
  0xa8   :  { %v123_v10 = vpop.f32.mrf.mxu0 }
  0xa9   :  { %v124_v11 = vadd.f32 %v191_v9, %v123_v10 }
  0xab   :  { %127 = vst [vmem:[#allocation7] sm:$0xff] %v124_v11 }
  0xac   :  { %138 = dma.vmem_to_hbm [thread:$0]  %s134_s25, 128, %s136_s28, [#allocation4]  }
  0xb0   :  { %v125_v12 = vpop.f32.mrf.mxu0 }
  0xb1   :  { %268 = dma.done.wait [#allocation4], 128  }
  0xb2   :  { %269 = vsyncadd [#allocation4], 4294967168 }
  0xb3   :  { %143 = vsyncpa [#allocation3], 1 }
  0xb4   :  { %144 = vsyncpa [#allocation6], 1 }
  0xb5   :  { %145 = vsyncpa [#allocation4], 1 }

</bundles_post_ra>
